<compile_context>
chip_gen: v7x
topology: tpu7x:2x2x1
jax: 0.10.0
libtpu: 0.0.40
codegen_flags: <defaults>
</compile_context>

<pallas_src>
import jax
import jax.numpy as jnp
from jax.experimental import pallas as pl
from jax.experimental.pallas import tpu as pltpu

_LANE = 128
_SUBLANE = 8
_MAX_BLOCK_BYTES = 2 * 1024 * 1024  # <=2 MiB/block -> 4 double-buffered copies
                                    # stay well under v5e's 16 MiB scoped VMEM.


def _copy_kernel(x_ref, o_ref):
    # Identity copy of the current VMEM tile.
    o_ref[...] = x_ref[...]


def _pick_2d_shape(n):
    """Pick a lane-dense (R, C) flattening of n elements (n % 128 == 0)."""
    lanes = n // _LANE
    c_lanes = 1
    for w in (32, 16, 8, 4, 2, 1):  # widest last dim up to 4096 that divides n
        if lanes % w == 0:
            c_lanes = w
            break
    C = c_lanes * _LANE
    R = n // C
    return R, C


def _pick_tile_r(R, C, itemsize):
    """Bounded row tile: multiple of 8 (or the full extent R if it all fits)."""
    max_rows = max(1, _MAX_BLOCK_BYTES // (C * itemsize))
    if R <= max_rows:
        return R  # whole extent in one block (block dim == full array dim)
    tile_r = (max_rows // _SUBLANE) * _SUBLANE
    return max(tile_r, _SUBLANE)


def _pallas_identity_copy(x2d):
    """Copy a lane-dense (R, C) array through a Pallas streaming-copy kernel."""
    R, C = x2d.shape
    tile_r = _pick_tile_r(R, C, x2d.dtype.itemsize)
    grid = (pl.cdiv(R, tile_r),)
    return pl.pallas_call(
        _copy_kernel,
        out_shape=jax.ShapeDtypeStruct((R, C), x2d.dtype),
        grid_spec=pltpu.PrefetchScalarGridSpec(
            num_scalar_prefetch=0,
            grid=grid,
            in_specs=[pl.BlockSpec((tile_r, C), lambda i: (i, 0))],
            out_specs=pl.BlockSpec((tile_r, C), lambda i: (i, 0)),
        ),
        compiler_params=pltpu.CompilerParams(
            dimension_semantics=("parallel",),
        ),
    )(x2d)


def _resolve_size(total, size):
    """Resolve a single -1 in the requested size, like torch.Tensor.view."""
    size = tuple(int(s) for s in size)
    if -1 in size:
        known = 1
        for s in size:
            if s != -1:
                known *= s
        size = tuple(total // known if s == -1 else s for s in size)
    return size


def view_forward(tensor, size):
    """JAX equivalent of View(size)(tensor).

    torch.view on a contiguous tensor is metadata-only; jnp.reshape is its
    exact equivalent and costs ~0 HBM traffic, so this is the default path.
    """
    return tensor.reshape(_resolve_size(tensor.size, size))


def view_forward_pallas(tensor, size):
    """Same semantics as view_forward, but routes the data through a Pallas
    identity-copy kernel (use only when a fresh materialized copy is needed)."""
    out_size = _resolve_size(tensor.size, size)
    n = tensor.size
    if n % _LANE != 0:
        # TODO(synk): no lane-aligned flattening without padding; padding would
        # add extra HBM passes, so use the metadata-only reshape instead.
        return tensor.reshape(out_size)
    R, C = _pick_2d_shape(n)
    flat2d = tensor.reshape(R, C)          # metadata-only
    out2d = _pallas_identity_copy(flat2d)  # single HBM read + write
    return out2d.reshape(out_size)         # metadata-only


if __name__ == "__main__":
    key = jax.random.PRNGKey(0)
    # Typical Beta-VAE usage: flatten conv features (N, C, H, W) -> (N, -1).
    x = jax.random.normal(key, (2, 4, 16, 16), dtype=jnp.float32)
    target_size = (2, -1)

    ref = x.reshape(2, -1)

    # Fast (metadata-only) path.
    y_fast = jax.block_until_ready(view_forward(x, target_size))
    assert y_fast.shape == ref.shape and y_fast.dtype == ref.dtype
    assert bool(jnp.all(y_fast == ref))

    # Pallas copy-kernel path (run the kernel once).
    y_pallas = jax.block_until_ready(view_forward_pallas(x, target_size))
    assert y_pallas.shape == ref.shape and y_pallas.dtype == ref.dtype
    assert bool(jnp.all(y_pallas == ref))

    print("KERNEL_OK")
</pallas_src>

<mosaic_0001>
module attributes {stable_mosaic.version = 11 : i64} {
  func.func @_copy_kernel(%arg0: i32, %arg1: memref<1x2048xf32, #tpu.memory_space<vmem>>, %arg2: memref<1x2048xf32, #tpu.memory_space<vmem>>) attributes {dimension_semantics = [#tpu.dimension_semantics<parallel>], iteration_bounds = array<i64: 1>, scalar_prefetch = 0 : i64, scratch_operands = 0 : i64, tpu.core_type = #tpu.core_type<tc>, window_params = [{transform_indices = @transform_0, window_bounds = array<i64: 1, 2048>}, {transform_indices = @transform_1, window_bounds = array<i64: 1, 2048>}]} {
    %c0 = arith.constant 0 : index
    %c0_0 = arith.constant 0 : index
    %0 = vector.load %arg1[%c0, %c0_0] : memref<1x2048xf32, #tpu.memory_space<vmem>>, vector<1x2048xf32>
    %c0_1 = arith.constant 0 : index
    %c0_2 = arith.constant 0 : index
    %1 = vector.load %arg2[%c0_1, %c0_2] : memref<1x2048xf32, #tpu.memory_space<vmem>>, vector<1x2048xf32>
    tpu.vector_store %arg2[%c0_1, %c0_2], %0 {strides = array<i32>} : memref<1x2048xf32, #tpu.memory_space<vmem>>, vector<1x2048xf32>,
    return
  }
  func.func @transform_0(%arg0: i32) -> (i32, i32) {
    %c0_i32 = arith.constant 0 : i32
    %c0_i32_0 = arith.constant 0 : i32
    return %arg0, %c0_i32 : i32, i32
  }
  func.func @transform_1(%arg0: i32) -> (i32, i32) {
    %c0_i32 = arith.constant 0 : i32
    %c0_i32_0 = arith.constant 0 : i32
    return %arg0, %c0_i32 : i32, i32
  }
}

</mosaic_0001>

<bundles_post_ra>
// kernel: tpu_custom_call.1
= control target key start
LH: loop header
LB: loop body
LE: loop exit
PB: predicated region body
PF: predicated region fallthrough
CT: control target
= control target key end

     0   :  { %6 = vsyncpa [#allocation3], 0  ;;  %s126_s0 = inlined_call_operand.hbm [shape: f32[1,2048], index: 0, kind: input, shape index: {}]   ;;  %s127_s1 = inlined_call_operand.hbm [shape: f32[1,2048], index: 1, kind: output, shape index: {}]  }
   0x1   :  { %7 = vsyncpa [#allocation4], 0  ;;  %s90_s6 = smov [#allocation2]   ;;  %s42_s10 = scalar_lea.hbm %s126_s0, 256 }
   0x2   :  { %s14_s7 = sshll.u32 %s90_s6, 4  ;;  %p43_p0 = scmp.ne.s32.totalorder %s126_s0, %s42_s10  ;;  %s15_s7 = int_to_ptr.vmem [resolvable:$true] %s14_s7 }
   0x3   :  { %p46_p1 = scmp.lt.u32.totalorder %s42_s10, %s126_s0 }
   0x5   :  { %p48_p2 = pnand %p46_p1, %p43_p0 }
   0x7   :  { %51 = shalt.err (!%p48_p2)
}
   0x8   :  { %s52_s15 = scalar_lea.vmem %s15_s7, 256  ;;  %p57_p4 = scmp.lt.s32.totalorder %s15_s7, %s15_s7 }
   0x9   :  { %p53_p3 = scmp.ne.s32.totalorder %s15_s7, %s52_s15  ;;  %p58_p5 = scmp.lt.s32.totalorder %s52_s15, %s52_s15 }
   0xb   :  { %p59_p6 = por %p58_p5, %p57_p4 }
   0xd   :  { %p60_p7 = pnand %p59_p6, %p53_p3 }
   0xf   :  { %63 = shalt.err (!%p60_p7)
}
  0x10   :  { %17 = dma.hbm_to_vmem [thread:$0]  %s126_s0, 256, %s15_s7, [#allocation3]  }
  0x11   :  { %86 = dma.done.wait [#allocation3], 256  }
  0x12   :  { %87 = vsyncadd [#allocation3], 4294967040  ;;  %s91_s18 = smov [#allocation5]   ;;  %v21_v0 = vld [vmem:[#allocation2] sm:$0xff]  ;;  %v22_v1 = vld [vmem:[#allocation2 + $0x8] sm:$0xff] }
  0x13   :  { %s31_s19 = sshll.u32 %s91_s18, 4  ;;  %23 = vst [vmem:[#allocation5] sm:$0xff] %v21_v0  ;;  %24 = vst [vmem:[#allocation5 + $0x8] sm:$0xff] %v22_v1  ;;  %s32_s19 = int_to_ptr.vmem [resolvable:$true] %s31_s19 }
  0x14   :  { %s64_s20 = scalar_lea.vmem %s32_s19, 256  ;;  %p69_p9 = scmp.lt.s32.totalorder %s32_s19, %s32_s19 }
  0x15   :  { %p65_p8 = scmp.ne.s32.totalorder %s32_s19, %s64_s20  ;;  %p70_p10 = scmp.lt.s32.totalorder %s64_s20, %s64_s20 }
  0x17   :  { %p71_p11 = por %p70_p10, %p69_p9 }
  0x19   :  { %p72_p12 = pnand %p71_p11, %p65_p8 }
  0x1b   :  { %75 = shalt.err (!%p72_p12)
}
  0x1c   :  { %s76_s0 = scalar_lea.hbm %s127_s1, 256 }
  0x1d   :  { %p77_p13 = scmp.ne.s32.totalorder %s127_s1, %s76_s0  ;;  %p80_p0 = scmp.lt.u32.totalorder %s76_s0, %s127_s1 }
  0x1f   :  { %p82_p1 = pnand %p80_p0, %p77_p13 }
  0x21   :  { %85 = shalt.err (!%p82_p1)
}
  0x22   :  { %34 = dma.vmem_to_hbm [thread:$0]  %s32_s19, 256, %s127_s1, [#allocation4]  }
  0x23   :  { %88 = dma.done.wait [#allocation4], 256  }
  0x24   :  { %89 = vsyncadd [#allocation4], 4294967040 }
  0x25   :  { %38 = vsyncpa [#allocation3], 1 }
  0x26   :  { %39 = vsyncpa [#allocation4], 1 }

</bundles_post_ra>
